<compile_context>
chip_gen: v7x
topology: tpu7x:2x2x1
jax: 0.10.0
libtpu: 0.0.40
codegen_flags: <defaults>
</compile_context>

<pallas_src>
import jax
import jax.numpy as jnp
from jax import lax
from jax.experimental import pallas as pl
from jax.experimental.pallas import tpu as pltpu


def _tpu_hw_params():
    """Generation-aware VMEM tile budget / scoped limit and input-dtype choice."""
    kind = ""
    try:
        kind = jax.devices()[0].device_kind.lower()
    except Exception:
        pass
    if ("v4" in kind) or ("v5" in kind) or ("v6" in kind):
        # 128 MiB physical VMEM: larger tiles amortize the ~0.35 us/step cost.
        return {
            "tile_budget": 20 * 1024 * 1024,
            "vmem_limit": 64 * 1024 * 1024,
            # bf16 VALU exists on v6e; v5e/v4 keep f32 (casts would land on VALU).
            "prefer_bf16": "v6" in kind,
        }
    # v7x (64 MiB physical VMEM) and unknown chips: conservative settings.
    return {
        "tile_budget": 12 * 1024 * 1024,
        "vmem_limit": 32 * 1024 * 1024,
        "prefer_bf16": "v7" in kind,
    }


def _choose_tile_m(m_pad, b, ci, co, in_bytes, vmem_budget_bytes):
    """Largest lane tile (multiple of 128, divides m_pad) whose double-buffered
    working set (x + w inputs at in_bytes, f32 output, plus accumulator
    headroom) fits the per-generation VMEM budget.  Capped at m_pad/2 so the
    grid keeps >= 2 parallel steps (shards across v7x's two TensorCores)."""
    per_col = 2 * 2 * (ci * b + ci * co) * in_bytes   # re+im inputs, double-buffered
    per_col += 2 * 2 * (b * co) * 4                   # f32 output, double-buffered
    per_col += 2 * (b * co) * 4                       # accumulator / temp headroom
    tm = (vmem_budget_bytes // per_col) // 128 * 128
    cap = max(128, (m_pad // 2) // 128 * 128)
    tm = int(max(128, min(tm, cap)))
    while m_pad % tm:
        tm -= 128
    return tm


def _choose_co_tile(co, b, tm, acc_budget_bytes=128 * 1024):
    """Largest divisor of Co whose f32 (re+im) accumulator footprint
    2*B*TCo*TM*4 bytes stays within ~half the 256 KiB vreg file (avoids spills
    at production channel counts; returns Co unchanged at toy sizes)."""
    tco = co
    while tco > 1 and 2 * b * tco * tm * 4 > acc_budget_bytes:
        tco -= 1
        while co % tco:
            tco -= 1
    return max(1, tco)


def spectral_corner_mul(x_packed, w_packed, *, B, Ci, Co, tile_budget, vmem_limit):
    """Per-mode complex channel contraction over the corner-folded mode axis.

    x_packed: (2, Ci*B,  M_pad)  axis 0 = (real, imag), row = i*B + b
    w_packed: (2, Ci*Co, M_pad)  axis 0 = (real, imag), row = i*Co + o
    returns : f32 (2, Co*B, M_pad), row = o*B + b, with
              out[:, o*B+b, m] = sum_i x[:, i*B+b, m] (*) w[:, i*Co+o, m]
              (complex multiply done on split real/imag parts, f32 accumulation).
    """
    _, _, M_pad = x_packed.shape
    in_bytes = jnp.dtype(x_packed.dtype).itemsize
    TM = _choose_tile_m(M_pad, B, Ci, Co, in_bytes, tile_budget)
    n_m_tiles = M_pad // TM
    TCo = _choose_co_tile(Co, B, TM)

    def kernel(x_ref, w_ref, o_ref):
        # x_ref: (2, Ci*B, TM), w_ref: (2, Ci*Co, TM), o_ref: (2, Co*B, TM) f32
        tm = o_ref.shape[-1]

        for co0 in range(0, Co, TCo):   # Co tiling bounds accumulator vreg pressure

            def accumulate(i, acc):
                acc_r, acc_i = acc
                xr = x_ref[0, pl.ds(i * B, B), :].astype(jnp.float32)[None, :, :]
                xi = x_ref[1, pl.ds(i * B, B), :].astype(jnp.float32)[None, :, :]
                wr = w_ref[0, pl.ds(i * Co + co0, TCo), :].astype(jnp.float32)[:, None, :]
                wi = w_ref[1, pl.ds(i * Co + co0, TCo), :].astype(jnp.float32)[:, None, :]
                # Karatsuba 3-mul complex product: re = k1 - k3, im = k1 + k2.
                k1 = wr * (xr + xi)
                k2 = xr * (wi - wr)
                k3 = xi * (wr + wi)
                return acc_r + (k1 - k3), acc_i + (k1 + k2)

            acc0 = (jnp.zeros((TCo, B, tm), jnp.float32),
                    jnp.zeros((TCo, B, tm), jnp.float32))
            if Ci < 16:
                # Small static channel count: fully-unrolled loop (static slices).
                acc = acc0
                for i in range(Ci):
                    acc = accumulate(i, acc)
            else:
                # Production channel counts: bounded unroll keeps code size and
                # live ranges sane while preserving LLO scheduling visibility.
                acc = lax.fori_loop(0, Ci, accumulate, acc0, unroll=4)
            acc_r, acc_i = acc

            # Store flattened (o-major) so the output block is sublane-dense.
            o_ref[0, co0 * B:(co0 + TCo) * B, :] = acc_r.reshape(TCo * B, tm)
            o_ref[1, co0 * B:(co0 + TCo) * B, :] = acc_i.reshape(TCo * B, tm)

    return pl.pallas_call(
        kernel,
        out_shape=jax.ShapeDtypeStruct((2, Co * B, M_pad), jnp.float32),
        grid_spec=pltpu.PrefetchScalarGridSpec(
            num_scalar_prefetch=0,
            grid=(n_m_tiles,),   # single (parallel) mode-tile axis
            in_specs=[
                pl.BlockSpec((2, Ci * B, TM), lambda t: (0, 0, t)),
                # NOTE: if the weight DMA is exposed at large Ci*Co / large M,
                # add pipeline_mode=pl.Buffered(3) here (costs VMEM on v7x).
                pl.BlockSpec((2, Ci * Co, TM), lambda t: (0, 0, t)),
            ],
            out_specs=pl.BlockSpec((2, Co * B, TM), lambda t: (0, 0, t)),
        ),
        compiler_params=pltpu.CompilerParams(
            dimension_semantics=("parallel",),
            vmem_limit_bytes=vmem_limit,
        ),
    )(x_packed, w_packed)


def _pack_real_imag(z, m_pad, dtype):
    """complex64 (R, M4) -> (2, R, m_pad) in `dtype`, zero-padded on the lane axis."""
    p = jnp.stack([jnp.real(z), jnp.imag(z)], axis=0)
    m = z.shape[-1]
    if m_pad != m:
        p = jnp.pad(p, [(0, 0)] * (p.ndim - 1) + [(0, m_pad - m)])
    return p.astype(dtype)


def spectral_conv3d(x, weights, modes, input_dtype=None):
    """Forward pass of SpectralConv3d.
    x: float32 (B, Ci, S1, S2, S3); weights: list of 4 complex64
    (Ci, Co, m1, m2, m3); modes = (m1, m2, m3).
    input_dtype: None -> auto (bf16 on v6e/v7x, f32 elsewhere)."""
    m1, m2, m3 = modes
    B, Ci, S1, S2, S3 = x.shape
    Co = weights[0].shape[1]
    M = m1 * m2 * m3
    M4 = 4 * M                              # four corners folded into the mode axis
    M_pad = ((M4 + 127) // 128) * 128       # pad once -> lane-dense blocks

    hw = _tpu_hw_params()
    if input_dtype is None:
        input_dtype = jnp.bfloat16 if hw["prefer_bf16"] else jnp.float32

    # TODO(synk): rfftn/irfftn have no Pallas equivalent; computed with jnp.fft outside the kernel.
    x_ft = jnp.fft.rfftn(x, axes=(-3, -2, -1))   # (B, Ci, S1, S2, S3//2+1), complex64

    # Gather the four retained low-frequency corners and fold them into the lane
    # axis: lane = corner*M + mode, row = i*B + b.  Kept as one slice/stack/
    # reshape chain so the wrapper materializes a single relayout copy.
    corner_list = [
        x_ft[:, :, :m1, :m2, :m3],
        x_ft[:, :, -m1:, :m2, :m3],
        x_ft[:, :, :m1, -m2:, :m3],
        x_ft[:, :, -m1:, -m2:, :m3],
    ]
    x_modes = jnp.stack([c.reshape(B, Ci, M) for c in corner_list], axis=2)  # (B,Ci,4,M)
    x_flat = x_modes.reshape(B, Ci, M4).transpose(1, 0, 2).reshape(Ci * B, M4)

    w_modes = jnp.stack([w.reshape(Ci, Co, M) for w in weights], axis=2)     # (Ci,Co,4,M)
    w_flat = w_modes.reshape(Ci * Co, M4)                                    # row = i*Co + o

    x_packed = _pack_real_imag(x_flat, M_pad, input_dtype)   # (2, Ci*B,  M_pad)
    w_packed = _pack_real_imag(w_flat, M_pad, input_dtype)   # (2, Ci*Co, M_pad)

    out_packed = spectral_corner_mul(
        x_packed, w_packed, B=B, Ci=Ci, Co=Co,
        tile_budget=hw["tile_budget"], vmem_limit=hw["vmem_limit"])

    out_c = (out_packed[0] + 1j * out_packed[1]).astype(jnp.complex64)  # (Co*B, M_pad)
    out_c = out_c[:, :M4].reshape(Co, B, 4, m1, m2, m3)
    out_c = out_c.transpose(2, 1, 0, 3, 4, 5)                           # (4, B, Co, m1, m2, m3)

    out_ft = jnp.zeros((B, Co, S1, S2, S3 // 2 + 1), dtype=jnp.complex64)
    out_ft = out_ft.at[:, :, :m1, :m2, :m3].set(out_c[0])
    out_ft = out_ft.at[:, :, -m1:, :m2, :m3].set(out_c[1])
    out_ft = out_ft.at[:, :, :m1, -m2:, :m3].set(out_c[2])
    out_ft = out_ft.at[:, :, -m1:, -m2:, :m3].set(out_c[3])

    x_out = jnp.fft.irfftn(out_ft, s=(S1, S2, S3), axes=(-3, -2, -1))
    return x_out.astype(x.dtype)


def _reference(x, weights, modes):
    """Pure-JAX reference mirroring the PyTorch forward."""
    m1, m2, m3 = modes
    B, Ci, S1, S2, S3 = x.shape
    Co = weights[0].shape[1]
    x_ft = jnp.fft.rfftn(x, axes=(-3, -2, -1))
    mul = lambda inp, w: jnp.einsum('bixyz,ioxyz->boxyz', inp, w)
    out_ft = jnp.zeros((B, Co, S1, S2, S3 // 2 + 1), dtype=jnp.complex64)
    out_ft = out_ft.at[:, :, :m1, :m2, :m3].set(mul(x_ft[:, :, :m1, :m2, :m3], weights[0]))
    out_ft = out_ft.at[:, :, -m1:, :m2, :m3].set(mul(x_ft[:, :, -m1:, :m2, :m3], weights[1]))
    out_ft = out_ft.at[:, :, :m1, -m2:, :m3].set(mul(x_ft[:, :, :m1, -m2:, :m3], weights[2]))
    out_ft = out_ft.at[:, :, -m1:, -m2:, :m3].set(mul(x_ft[:, :, -m1:, -m2:, :m3], weights[3]))
    return jnp.fft.irfftn(out_ft, s=(S1, S2, S3), axes=(-3, -2, -1)).astype(x.dtype)


if __name__ == "__main__":
    # Small shapes consistent with the module.
    B, Ci, Co = 2, 4, 4
    S1 = S2 = S3 = 16
    m1, m2, m3 = 4, 4, 3
    scale = 1.0 / (Ci * Co)

    key = jax.random.PRNGKey(0)
    kx, *kw = jax.random.split(key, 9)
    x = jax.random.normal(kx, (B, Ci, S1, S2, S3), dtype=jnp.float32)

    # Deterministic init matching torch.rand(..., dtype=cfloat): uniform [0,1)
    # real and imaginary parts, scaled by 1/(in*out).
    weights = []
    for j in range(4):
        wr = jax.random.uniform(kw[2 * j], (Ci, Co, m1, m2, m3), dtype=jnp.float32)
        wi = jax.random.uniform(kw[2 * j + 1], (Ci, Co, m1, m2, m3), dtype=jnp.float32)
        weights.append((scale * (wr + 1j * wi)).astype(jnp.complex64))

    fwd = jax.jit(spectral_conv3d, static_argnums=(2, 3))
    ref = jax.block_until_ready(_reference(x, weights, (m1, m2, m3)))

    # Full-precision path (f32 inputs) — strict correctness check.
    out = jax.block_until_ready(fwd(x, weights, (m1, m2, m3), jnp.float32))
    assert out.shape == (B, Co, S1, S2, S3)
    assert jnp.allclose(out, ref, atol=1e-4, rtol=1e-4), "mismatch vs reference"

    # Generation-preferred path (bf16 inputs on v6e/v7x; identical f32 path elsewhere).
    out_auto = jax.block_until_ready(fwd(x, weights, (m1, m2, m3), None))
    max_err = float(jnp.max(jnp.abs(out_auto - ref)))
    assert max_err <= 5e-2 * float(jnp.max(jnp.abs(ref))) + 1e-3, "auto-dtype path diverged"

    print("KERNEL_OK")
</pallas_src>

<mosaic_0001>
module attributes {stable_mosaic.version = 11 : i64} {
  func.func @kernel(%arg0: i32, %arg1: memref<2x8x128xf32, #tpu.memory_space<vmem>>, %arg2: memref<2x16x128xf32, #tpu.memory_space<vmem>>, %arg3: memref<2x8x128xf32, #tpu.memory_space<vmem>>) attributes {dimension_semantics = [#tpu.dimension_semantics<parallel>], iteration_bounds = array<i64: 2>, scalar_prefetch = 0 : i64, scratch_operands = 0 : i64, tpu.core_type = #tpu.core_type<tc>, window_params = [{transform_indices = @transform_0, window_bounds = array<i64: 2, 8, 128>}, {transform_indices = @transform_1, window_bounds = array<i64: 2, 16, 128>}, {transform_indices = @transform_2, window_bounds = array<i64: 2, 8, 128>}]} {
    %cst = arith.constant 0.000000e+00 : f32
    %0 = vector.broadcast %cst : f32 to vector<4x2x128xf32>
    %cst_0 = arith.constant 0.000000e+00 : f32
    %1 = vector.broadcast %cst_0 : f32 to vector<4x2x128xf32>
    %c0 = arith.constant 0 : index
    %c0_1 = arith.constant 0 : index
    %c0_2 = arith.constant 0 : index
    %2 = vector.load %arg1[%c0, %c0_1, %c0_2] : memref<2x8x128xf32, #tpu.memory_space<vmem>>, vector<1x2x128xf32>
    %3 = vector.shape_cast %2 : vector<1x2x128xf32> to vector<2x128xf32>
    %4 = vector.shape_cast %3 : vector<2x128xf32> to vector<1x2x128xf32>
    %c1 = arith.constant 1 : index
    %c0_3 = arith.constant 0 : index
    %c0_4 = arith.constant 0 : index
    %5 = vector.load %arg1[%c1, %c0_3, %c0_4] : memref<2x8x128xf32, #tpu.memory_space<vmem>>, vector<1x2x128xf32>
    %6 = vector.shape_cast %5 : vector<1x2x128xf32> to vector<2x128xf32>
    %7 = vector.shape_cast %6 : vector<2x128xf32> to vector<1x2x128xf32>
    %c0_5 = arith.constant 0 : index
    %c0_6 = arith.constant 0 : index
    %c0_7 = arith.constant 0 : index
    %8 = vector.load %arg2[%c0_5, %c0_6, %c0_7] : memref<2x16x128xf32, #tpu.memory_space<vmem>>, vector<1x4x128xf32>
    %9 = vector.shape_cast %8 : vector<1x4x128xf32> to vector<4x128xf32>
    %10 = vector.shape_cast %9 : vector<4x128xf32> to vector<4x1x128xf32>
    %c1_8 = arith.constant 1 : index
    %c0_9 = arith.constant 0 : index
    %c0_10 = arith.constant 0 : index
    %11 = vector.load %arg2[%c1_8, %c0_9, %c0_10] : memref<2x16x128xf32, #tpu.memory_space<vmem>>, vector<1x4x128xf32>
    %12 = vector.shape_cast %11 : vector<1x4x128xf32> to vector<4x128xf32>
    %13 = vector.shape_cast %12 : vector<4x128xf32> to vector<4x1x128xf32>
    %14 = arith.addf %4, %7 : vector<1x2x128xf32>
    %15 = vector.broadcast %10 : vector<4x1x128xf32> to vector<4x2x128xf32>
    %16 = vector.broadcast %14 : vector<1x2x128xf32> to vector<4x2x128xf32>
    %17 = arith.mulf %15, %16 : vector<4x2x128xf32>
    %18 = arith.subf %13, %10 : vector<4x1x128xf32>
    %19 = vector.broadcast %4 : vector<1x2x128xf32> to vector<4x2x128xf32>
    %20 = vector.broadcast %18 : vector<4x1x128xf32> to vector<4x2x128xf32>
    %21 = arith.mulf %19, %20 : vector<4x2x128xf32>
    %22 = arith.addf %10, %13 : vector<4x1x128xf32>
    %23 = vector.broadcast %7 : vector<1x2x128xf32> to vector<4x2x128xf32>
    %24 = vector.broadcast %22 : vector<4x1x128xf32> to vector<4x2x128xf32>
    %25 = arith.mulf %23, %24 : vector<4x2x128xf32>
    %26 = arith.subf %17, %25 : vector<4x2x128xf32>
    %27 = arith.addf %0, %26 : vector<4x2x128xf32>
    %28 = arith.addf %17, %21 : vector<4x2x128xf32>
    %29 = arith.addf %1, %28 : vector<4x2x128xf32>
    %c0_11 = arith.constant 0 : index
    %c2 = arith.constant 2 : index
    %c0_12 = arith.constant 0 : index
    %30 = vector.load %arg1[%c0_11, %c2, %c0_12] : memref<2x8x128xf32, #tpu.memory_space<vmem>>, vector<1x2x128xf32>
    %31 = vector.shape_cast %30 : vector<1x2x128xf32> to vector<2x128xf32>
    %32 = vector.shape_cast %31 : vector<2x128xf32> to vector<1x2x128xf32>
    %c1_13 = arith.constant 1 : index
    %c2_14 = arith.constant 2 : index
    %c0_15 = arith.constant 0 : index
    %33 = vector.load %arg1[%c1_13, %c2_14, %c0_15] : memref<2x8x128xf32, #tpu.memory_space<vmem>>, vector<1x2x128xf32>
    %34 = vector.shape_cast %33 : vector<1x2x128xf32> to vector<2x128xf32>
    %35 = vector.shape_cast %34 : vector<2x128xf32> to vector<1x2x128xf32>
    %c0_16 = arith.constant 0 : index
    %c4 = arith.constant 4 : index
    %c0_17 = arith.constant 0 : index
    %36 = vector.load %arg2[%c0_16, %c4, %c0_17] : memref<2x16x128xf32, #tpu.memory_space<vmem>>, vector<1x4x128xf32>
    %37 = vector.shape_cast %36 : vector<1x4x128xf32> to vector<4x128xf32>
    %38 = vector.shape_cast %37 : vector<4x128xf32> to vector<4x1x128xf32>
    %c1_18 = arith.constant 1 : index
    %c4_19 = arith.constant 4 : index
    %c0_20 = arith.constant 0 : index
    %39 = vector.load %arg2[%c1_18, %c4_19, %c0_20] : memref<2x16x128xf32, #tpu.memory_space<vmem>>, vector<1x4x128xf32>
    %40 = vector.shape_cast %39 : vector<1x4x128xf32> to vector<4x128xf32>
    %41 = vector.shape_cast %40 : vector<4x128xf32> to vector<4x1x128xf32>
    %42 = arith.addf %32, %35 : vector<1x2x128xf32>
    %43 = vector.broadcast %38 : vector<4x1x128xf32> to vector<4x2x128xf32>
    %44 = vector.broadcast %42 : vector<1x2x128xf32> to vector<4x2x128xf32>
    %45 = arith.mulf %43, %44 : vector<4x2x128xf32>
    %46 = arith.subf %41, %38 : vector<4x1x128xf32>
    %47 = vector.broadcast %32 : vector<1x2x128xf32> to vector<4x2x128xf32>
    %48 = vector.broadcast %46 : vector<4x1x128xf32> to vector<4x2x128xf32>
    %49 = arith.mulf %47, %48 : vector<4x2x128xf32>
    %50 = arith.addf %38, %41 : vector<4x1x128xf32>
    %51 = vector.broadcast %35 : vector<1x2x128xf32> to vector<4x2x128xf32>
    %52 = vector.broadcast %50 : vector<4x1x128xf32> to vector<4x2x128xf32>
    %53 = arith.mulf %51, %52 : vector<4x2x128xf32>
    %54 = arith.subf %45, %53 : vector<4x2x128xf32>
    %55 = arith.addf %27, %54 : vector<4x2x128xf32>
    %56 = arith.addf %45, %49 : vector<4x2x128xf32>
    %57 = arith.addf %29, %56 : vector<4x2x128xf32>
    %c0_21 = arith.constant 0 : index
    %c4_22 = arith.constant 4 : index
    %c0_23 = arith.constant 0 : index
    %58 = vector.load %arg1[%c0_21, %c4_22, %c0_23] : memref<2x8x128xf32, #tpu.memory_space<vmem>>, vector<1x2x128xf32>
    %59 = vector.shape_cast %58 : vector<1x2x128xf32> to vector<2x128xf32>
    %60 = vector.shape_cast %59 : vector<2x128xf32> to vector<1x2x128xf32>
    %c1_24 = arith.constant 1 : index
    %c4_25 = arith.constant 4 : index
    %c0_26 = arith.constant 0 : index
    %61 = vector.load %arg1[%c1_24, %c4_25, %c0_26] : memref<2x8x128xf32, #tpu.memory_space<vmem>>, vector<1x2x128xf32>
    %62 = vector.shape_cast %61 : vector<1x2x128xf32> to vector<2x128xf32>
    %63 = vector.shape_cast %62 : vector<2x128xf32> to vector<1x2x128xf32>
    %c0_27 = arith.constant 0 : index
    %c8 = arith.constant 8 : index
    %c0_28 = arith.constant 0 : index
    %64 = vector.load %arg2[%c0_27, %c8, %c0_28] : memref<2x16x128xf32, #tpu.memory_space<vmem>>, vector<1x4x128xf32>
    %65 = vector.shape_cast %64 : vector<1x4x128xf32> to vector<4x128xf32>
    %66 = vector.shape_cast %65 : vector<4x128xf32> to vector<4x1x128xf32>
    %c1_29 = arith.constant 1 : index
    %c8_30 = arith.constant 8 : index
    %c0_31 = arith.constant 0 : index
    %67 = vector.load %arg2[%c1_29, %c8_30, %c0_31] : memref<2x16x128xf32, #tpu.memory_space<vmem>>, vector<1x4x128xf32>
    %68 = vector.shape_cast %67 : vector<1x4x128xf32> to vector<4x128xf32>
    %69 = vector.shape_cast %68 : vector<4x128xf32> to vector<4x1x128xf32>
    %70 = arith.addf %60, %63 : vector<1x2x128xf32>
    %71 = vector.broadcast %66 : vector<4x1x128xf32> to vector<4x2x128xf32>
    %72 = vector.broadcast %70 : vector<1x2x128xf32> to vector<4x2x128xf32>
    %73 = arith.mulf %71, %72 : vector<4x2x128xf32>
    %74 = arith.subf %69, %66 : vector<4x1x128xf32>
    %75 = vector.broadcast %60 : vector<1x2x128xf32> to vector<4x2x128xf32>
    %76 = vector.broadcast %74 : vector<4x1x128xf32> to vector<4x2x128xf32>
    %77 = arith.mulf %75, %76 : vector<4x2x128xf32>
    %78 = arith.addf %66, %69 : vector<4x1x128xf32>
    %79 = vector.broadcast %63 : vector<1x2x128xf32> to vector<4x2x128xf32>
    %80 = vector.broadcast %78 : vector<4x1x128xf32> to vector<4x2x128xf32>
    %81 = arith.mulf %79, %80 : vector<4x2x128xf32>
    %82 = arith.subf %73, %81 : vector<4x2x128xf32>
    %83 = arith.addf %55, %82 : vector<4x2x128xf32>
    %84 = arith.addf %73, %77 : vector<4x2x128xf32>
    %85 = arith.addf %57, %84 : vector<4x2x128xf32>
    %c0_32 = arith.constant 0 : index
    %c6 = arith.constant 6 : index
    %c0_33 = arith.constant 0 : index
    %86 = vector.load %arg1[%c0_32, %c6, %c0_33] : memref<2x8x128xf32, #tpu.memory_space<vmem>>, vector<1x2x128xf32>
    %87 = vector.shape_cast %86 : vector<1x2x128xf32> to vector<2x128xf32>
    %88 = vector.shape_cast %87 : vector<2x128xf32> to vector<1x2x128xf32>
    %c1_34 = arith.constant 1 : index
    %c6_35 = arith.constant 6 : index
    %c0_36 = arith.constant 0 : index
    %89 = vector.load %arg1[%c1_34, %c6_35, %c0_36] : memref<2x8x128xf32, #tpu.memory_space<vmem>>, vector<1x2x128xf32>
    %90 = vector.shape_cast %89 : vector<1x2x128xf32> to vector<2x128xf32>
    %91 = vector.shape_cast %90 : vector<2x128xf32> to vector<1x2x128xf32>
    %c0_37 = arith.constant 0 : index
    %c12 = arith.constant 12 : index
    %c0_38 = arith.constant 0 : index
    %92 = vector.load %arg2[%c0_37, %c12, %c0_38] : memref<2x16x128xf32, #tpu.memory_space<vmem>>, vector<1x4x128xf32>
    %93 = vector.shape_cast %92 : vector<1x4x128xf32> to vector<4x128xf32>
    %94 = vector.shape_cast %93 : vector<4x128xf32> to vector<4x1x128xf32>
    %c1_39 = arith.constant 1 : index
    %c12_40 = arith.constant 12 : index
    %c0_41 = arith.constant 0 : index
    %95 = vector.load %arg2[%c1_39, %c12_40, %c0_41] : memref<2x16x128xf32, #tpu.memory_space<vmem>>, vector<1x4x128xf32>
    %96 = vector.shape_cast %95 : vector<1x4x128xf32> to vector<4x128xf32>
    %97 = vector.shape_cast %96 : vector<4x128xf32> to vector<4x1x128xf32>
    %98 = arith.addf %88, %91 : vector<1x2x128xf32>
    %99 = vector.broadcast %94 : vector<4x1x128xf32> to vector<4x2x128xf32>
    %100 = vector.broadcast %98 : vector<1x2x128xf32> to vector<4x2x128xf32>
    %101 = arith.mulf %99, %100 : vector<4x2x128xf32>
    %102 = arith.subf %97, %94 : vector<4x1x128xf32>
    %103 = vector.broadcast %88 : vector<1x2x128xf32> to vector<4x2x128xf32>
    %104 = vector.broadcast %102 : vector<4x1x128xf32> to vector<4x2x128xf32>
    %105 = arith.mulf %103, %104 : vector<4x2x128xf32>
    %106 = arith.addf %94, %97 : vector<4x1x128xf32>
    %107 = vector.broadcast %91 : vector<1x2x128xf32> to vector<4x2x128xf32>
    %108 = vector.broadcast %106 : vector<4x1x128xf32> to vector<4x2x128xf32>
    %109 = arith.mulf %107, %108 : vector<4x2x128xf32>
    %110 = arith.subf %101, %109 : vector<4x2x128xf32>
    %111 = arith.addf %83, %110 : vector<4x2x128xf32>
    %112 = arith.addf %101, %105 : vector<4x2x128xf32>
    %113 = arith.addf %85, %112 : vector<4x2x128xf32>
    %114 = vector.shape_cast %111 : vector<4x2x128xf32> to vector<8x128xf32>
    %c0_42 = arith.constant 0 : index
    %c0_43 = arith.constant 0 : index
    %c0_44 = arith.constant 0 : index
    %115 = vector.load %arg3[%c0_42, %c0_43, %c0_44] : memref<2x8x128xf32, #tpu.memory_space<vmem>>, vector<1x8x128xf32>
    %116 = vector.shape_cast %115 : vector<1x8x128xf32> to vector<8x128xf32>
    %117 = vector.shape_cast %114 : vector<8x128xf32> to vector<1x8x128xf32>
    tpu.vector_store %arg3[%c0_42, %c0_43, %c0_44], %117 {strides = array<i32>} : memref<2x8x128xf32, #tpu.memory_space<vmem>>, vector<1x8x128xf32>,
    %118 = vector.shape_cast %113 : vector<4x2x128xf32> to vector<8x128xf32>
    %c1_45 = arith.constant 1 : index
    %c0_46 = arith.constant 0 : index
    %c0_47 = arith.constant 0 : index
    %119 = vector.load %arg3[%c1_45, %c0_46, %c0_47] : memref<2x8x128xf32, #tpu.memory_space<vmem>>, vector<1x8x128xf32>
    %120 = vector.shape_cast %119 : vector<1x8x128xf32> to vector<8x128xf32>
    %121 = vector.shape_cast %118 : vector<8x128xf32> to vector<1x8x128xf32>
    tpu.vector_store %arg3[%c1_45, %c0_46, %c0_47], %121 {strides = array<i32>} : memref<2x8x128xf32, #tpu.memory_space<vmem>>, vector<1x8x128xf32>,
    return
  }
  func.func @transform_0(%arg0: i32) -> (i32, i32, i32) {
    %c0_i32 = arith.constant 0 : i32
    %c0_i32_0 = arith.constant 0 : i32
    %c0_i32_1 = arith.constant 0 : i32
    return %c0_i32, %c0_i32_0, %arg0 : i32, i32, i32
  }
  func.func @transform_1(%arg0: i32) -> (i32, i32, i32) {
    %c0_i32 = arith.constant 0 : i32
    %c0_i32_0 = arith.constant 0 : i32
    %c0_i32_1 = arith.constant 0 : i32
    return %c0_i32, %c0_i32_0, %arg0 : i32, i32, i32
  }
  func.func @transform_2(%arg0: i32) -> (i32, i32, i32) {
    %c0_i32 = arith.constant 0 : i32
    %c0_i32_0 = arith.constant 0 : i32
    %c0_i32_1 = arith.constant 0 : i32
    return %c0_i32, %c0_i32_0, %arg0 : i32, i32, i32
  }
}

</mosaic_0001>

<bundles_post_ra>
// kernel: custom-call
= control target key start
LH: loop header
LB: loop body
LE: loop exit
PB: predicated region body
PF: predicated region fallthrough
CT: control target
= control target key end

     0   :  { %2 = vsyncpa [#allocation0], 0  ;;  %s61_s0 = inlined_call_operand.hbm [shape: c64[4,4,4,4,3], index: 0, kind: input, shape index: {}]   ;;  %s62_s1 = inlined_call_operand.vmem [shape: f32[4,4,4,4,3], index: 1, kind: output, shape index: {}]  }
   0x1   :  { %s3_s8 = sshll.u32 %s62_s1, 4  ;;  %s9_s11 = scalar_lea.hbm %s61_s0, 3072  ;;  %s4_s8 = int_to_ptr.vmem [resolvable:$true] %s3_s8 }
   0x2   :  { %p10_p0 = scmp.ne.s32.totalorder %s61_s0, %s9_s11  ;;  %s11_s16 = scalar_lea.hbm %s61_s0, 6144 }
   0x3   :  { %p12_p1 = scmp.lt.u32.totalorder %s11_s16, %s9_s11  ;;  %p13_p2 = scmp.lt.u32.totalorder %s9_s11, %s61_s0 }
   0x5   :  { %p14_p3 = por %p13_p2, %p12_p1 }
   0x7   :  { %p15_p4 = pnand %p14_p3, %p10_p0 }
   0x9   :  { %18 = shalt.err (!%p15_p4)  }
   0xa   :  { %s19_s1 = scalar_lea.vmem %s4_s8, 3072  ;;  %p24_p6 = scmp.lt.s32.totalorder %s4_s8, %s4_s8 }
   0xb   :  { %p20_p5 = scmp.ne.s32.totalorder %s4_s8, %s19_s1  ;;  %p25_p7 = scmp.lt.s32.totalorder %s19_s1, %s19_s1 }
   0xd   :  { %p26_p8 = por %p25_p7, %p24_p6 }
   0xf   :  { %p27_p9 = pnand %p26_p8, %p20_p5 }
  0x11   :  { %30 = shalt.err (!%p27_p9)  }
  0x12   :  { %6 = dma.hbm_to_vmem [thread:$0]  %s61_s0, 3072, %s4_s8, [#allocation0] }
  0x13   :  { %31 = dma.done.wait [#allocation0], 3072  }
  0x14   :  { %32 = vsyncadd [#allocation0], 4294964224 }
  0x15   :  { %8 = vsyncpa [#allocation0], 1 }

// kernel: custom-call.1
= control target key start
LH: loop header
LB: loop body
LE: loop exit
PB: predicated region body
PF: predicated region fallthrough
CT: control target
= control target key end

     0   :  { %s59_s0 = inlined_call_operand.hbm [shape: c64[4,4,4,4,3], index: 0, kind: input, shape index: {}]   ;;  %s60_s1 = inlined_call_operand.vmem [shape: f32[4,4,4,4,3], index: 1, kind: output, shape index: {}]  }
   0x1   :  { %s2_s8 = scalar_lea.hbm %s59_s0, 3072 }
   0x2   :  { %3 = vsyncpa [#allocation0], 0  ;;  %s4_s11 = sshll.u32 %s60_s1, 4  ;;  %s34_s14 = scalar_lea.hbm %s59_s0, 6144  ;;  %s5_s11 = int_to_ptr.vmem [resolvable:$true] %s4_s11 }
   0x3   :  { %p11_p0 = scmp.ne.s32.totalorder %s2_s8, %s34_s14  ;;  %p13_p1 = scmp.lt.u32.totalorder %s2_s8, %s59_s0 }
   0x4   :  { %p14_p2 = scmp.lt.u32.totalorder %s34_s14, %s34_s14  ;;  %p16_p4 = scmp.lt.u32.totalorder %s34_s14, %s2_s8 }
   0x6   :  { %p15_p3 = por %p14_p2, %p13_p1 }
   0x8   :  { %p17_p5 = por %p16_p4, %p15_p3 }
   0xa   :  { %p18_p6 = pnand %p17_p5, %p11_p0 }
   0xc   :  { %21 = shalt.err (!%p18_p6)  }
   0xd   :  { %s22_s17 = scalar_lea.vmem %s5_s11, 3072  ;;  %p27_p8 = scmp.lt.s32.totalorder %s5_s11, %s5_s11 }
   0xe   :  { %p23_p7 = scmp.ne.s32.totalorder %s5_s11, %s22_s17  ;;  %p28_p9 = scmp.lt.s32.totalorder %s22_s17, %s22_s17 }
  0x10   :  { %p29_p10 = por %p28_p9, %p27_p8 }
  0x12   :  { %p30_p11 = pnand %p29_p10, %p23_p7 }
  0x14   :  { %33 = shalt.err (!%p30_p11)  }
  0x15   :  { %7 = dma.hbm_to_vmem [thread:$0]  %s2_s8, 3072, %s5_s11, [#allocation0] }
  0x16   :  { %35 = dma.done.wait [#allocation0], 3072  }
  0x17   :  { %36 = vsyncadd [#allocation0], 4294964224 }
  0x18   :  { %9 = vsyncpa [#allocation0], 1 }

// kernel: spectral_conv3d.1
= control target key start
LH: loop header
LB: loop body
LE: loop exit
PB: predicated region body
PF: predicated region fallthrough
CT: control target
= control target key end

     0   :  { %s1178_s9 = smov 0   ;;  %s1180_s10 = smov 0   ;;  %s1418_s0 = inlined_call_operand.vmem [shape: f32[2,8,256], index: 0, kind: input, shape index: {}]   ;;  %s1419_s1 = inlined_call_operand.vmem [shape: f32[2,16,256], index: 1, kind: input, shape index: {}]   ;;  %s1420_s2 = inlined_call_operand.vmem [shape: f32[2,8,256], index: 2, kind: output, shape index: {}]  }
   0x1   :  { %s1182_s11 = smov 0  }
   0x2 LB: > { %s1078_s12 = sadd.s32 4294967295, %s1159_s11   ;;  %s1195_s13 = sadd.s32 1, %s1159_s11   ;;  %s1159_s11 = sphi %s1182_s11, %s1425_s11   ;;  %s1155_s10 = sphi %s1180_s10, %s1424_s10   ;;  %s1151_s9 = sphi %s1178_s9, %s1423_s9  }
   0x3   : > { %s16_s14 = ssub.s32 %s1159_s11, %s1195_s13  ;;  %s19_s15 = sadd.s32 1, %s1155_s10 }
   0x4   : > { %p17_p0 = scmp.eq.s32.totalorder %s16_s14, 0  ;;  %p26_p1 = scmp.ne.s32.totalorder %s1155_s10, %s1151_s9 }
   0x5   : > { %p27_p2 = scmp.eq.s32.totalorder %s1159_s11, 0  ;;  %p82_p3 = scmp.eq.s32.totalorder %s1078_s12, 1 }
   0x6   : > { %s1206_s16 = scalar_select %p17_p0, %s1155_s10, %s19_s15  }
   0x7   : > { %p1208_p4 = por %p27_p2, %p26_p1  ;;  %p1212_p5 = por %p82_p3, %p26_p1 }
   0x8   : > { %p1081_p6 = scmp.ge.s32.totalorder %s1159_s11, 2 }
   0xa   : > { %104 = sbr.rel (%p1081_p6) target bundleno = 31 (0x1f), region = 16 }
  0x11   : > { %107 = sbr.rel (!%p1208_p4) target bundleno = 24 (0x18), region = 20  ;;  %s109_s19 = sand.u32 (%p1208_p4), 1, %s1155_s10  }
  0x12   : > { %s1083_s20 = sshll.u32 (%p1208_p4), %s1159_s11, 3  ;;  %s1082_s21 = sshll.u32 (%p1208_p4), %s109_s19, 4 }
  0x13   : > { %s113_s24 = scalar_lea.vmem (%p1208_p4), %s1418_s0, %s1083_s20  ;;  %s111_s25 = scalar_lea.vmem (%p1208_p4), [#allocation2], %s1082_s21 }
  0x14   : > { %v143_v0 = vld [vmem:[%s113_s24] sm:$0xff] (%p1208_p4)  ;;  %v145_v1 = vld [vmem:[%s113_s24 + $0x10] sm:$0xff] (%p1208_p4) }
  0x15   : > { %144 = vst [vmem:[%s111_s25] sm:$0xff] (%p1208_p4), %v143_v0  ;;  %146 = vst [vmem:[%s111_s25 + $0x8] sm:$0xff] (%p1208_p4), %v145_v1 }
  0x18 PF: > { %152 = sbr.rel (!%p1208_p4) target bundleno = 31 (0x1f), region = 58  ;;  %s154_s26 = sand.u32 (%p1208_p4), 1, %s1155_s10  }
  0x19   : > { %s1085_s27 = sshll.u32 (%p1208_p4), %s1159_s11, 3  ;;  %s1084_s28 = sshll.u32 (%p1208_p4), %s154_s26, 5 }
  0x1a   : > { %s158_s3 = scalar_lea.vmem (%p1208_p4), %s1419_s1, %s1085_s27  ;;  %s156_s4 = scalar_lea.vmem (%p1208_p4), [#allocation3], %s1084_s28 }
  0x1b   : > { %v192_v2 = vld [vmem:[%s158_s3] sm:$0xff] (%p1208_p4)  ;;  %v194_v3 = vld [vmem:[%s158_s3 + $0x10] sm:$0xff] (%p1208_p4) }
  0x1c   : > { %v196_v4 = vld [vmem:[%s158_s3 + $0x20] sm:$0xff] (%p1208_p4)  ;;  %193 = vst [vmem:[%s156_s4] sm:$0xff] (%p1208_p4), %v192_v2  ;;  %195 = vst [vmem:[%s156_s4 + $0x8] sm:$0xff] (%p1208_p4), %v194_v3  ;;  %v198_v5 = vld [vmem:[%s158_s3 + $0x30] sm:$0xff] (%p1208_p4) }
  0x1d   : > { %197 = vst [vmem:[%s156_s4 + $0x10] sm:$0xff] (%p1208_p4), %v196_v4  ;;  %199 = vst [vmem:[%s156_s4 + $0x18] sm:$0xff] (%p1208_p4), %v198_v5 }
  0x1f PF: > { %p1086_p7 = scmp.ge.s32.totalorder %s1159_s11, 1  ;;  %p204_p8 = scmp.lt.s32.totalorder %s1159_s11, 3 }
  0x21   : > { %p205_p9 = pnand %p1086_p7, %p204_p8 }
  0x22   : > { %s211_s5 = sand.u32 (!%p205_p9), 1, %s1151_s9   ;;  %v258_v6 = vlaneseq (!%p205_p9)  ;;  %v1161_v7 = vmov (!%p205_p9), 1966171168   ;;  %v1162_v9 = vmov (!%p205_p9), 1983009808  }
  0x23   : > { %208 = sbr.rel (%p205_p9) target bundleno = 115 (0x73), region = 96  ;;  %s1234_s6 = sshll.u32 (!%p205_p9), %s211_s5, 4  ;;  %v256_v8 = vunpack.c.l.s4 (!%p205_p9), %v1161_v7  ;;  %v919_v10 = vunpack.c.l.s4 (!%p205_p9), %v1162_v9 }
  0x24   : > { %s1088_s7 = sshll.u32 (!%p205_p9), %s211_s5, 5  ;;  %v259_v11 = vshrl.u32 (!%p205_p9), %v258_v6, 7  ;;  %s1237_s8 = scalar_lea.vmem (!%p205_p9), [#allocation2], %s1234_s6 }
  0x25   : > { %v242_v12 = vld [vmem:[%s1237_s8] sm:$0x3] (!%p205_p9)  ;;  %v1241_v13 = vld [vmem:[%s1237_s8 + $0x8] sm:$0x3] (!%p205_p9)  ;;  %v257_v14 = vunpack.c.0.s8 (!%p205_p9), %v256_v8  ;;  %v920_v15 = vunpack.c.0.s8 (!%p205_p9), %v919_v10  ;;  %s1243_s9 = scalar_lea.vmem (!%p205_p9), [#allocation3], %s1088_s7  ;;  %s241_s14 = scalar_lea.vmem (!%p205_p9), [#allocation4], %s1234_s6 }
  0x26   : > { %v1091_v16 = vld.sshfl [vmem:[%s1243_s9] sm:$0x33 pattern:$0x75316420] (!%p205_p9)  ;;  %v1249_v20 = vsub.s32 (!%p205_p9), 0, %v259_v11  ;;  %v306_v22 = vadd.f32 (!%p205_p9), %v1241_v13, %v242_v12 }
  0x27   : > { %v254_v17 = vcombine.high (!%p205_p9), %v1091_v16, %v1091_v16  ;;  %v1246_v18 = vsub.s32 (!%p205_p9), %v257_v14, %v259_v11  ;;  %v1093_v19 = vld.sshfl [vmem:[%s1243_s9 + $0x10] sm:$0x33 pattern:$0x75316420] (!%p205_p9)  ;;  %v1253_v24 = vsub.s32 (!%p205_p9), %v920_v15, %v259_v11  ;;  %v1094_v7 = vld [vmem:[%s1237_s8 + $0xa] sm:$0x3] (!%p205_p9) }
  0x28   : > { %v285_v21 = vcombine.high (!%p205_p9), %v1093_v19, %v1093_v19  ;;  %v1095_v23 = vld.sshfl [vmem:[%s1243_s9 + $0x4] sm:$0x33 pattern:$0x75316420] (!%p205_p9)  ;;  %v411_v6 = vld [vmem:[%s1237_s8 + $0x2] sm:$0x3] (!%p205_p9) }
  0x29   : > { %v261_v25 = vrot.slane (!%p205_p9), %v1091_v16, %v1246_v18  ;;  %v268_v26 = vrot.slane (!%p205_p9), %v254_v17, %v1246_v18  ;;  %v292_v27 = vrot.slane (!%p205_p9), %v1093_v19, %v1246_v18  ;;  %v422_v28 = vcombine.high (!%p205_p9), %v1095_v23, %v1095_v23  ;;  %v1097_v29 = vld.sshfl [vmem:[%s1243_s9 + $0x14] sm:$0x33 pattern:$0x75316420] (!%p205_p9) }
  0x2a   : > { %v299_v30 = vrot.slane %v285_v21, %v1246_v18  ;;  %v1261_v31 = vrot.slane %v1095_v23, %v1246_v18  ;;  %v452_v32 = vcombine.high %v1097_v29, %v1097_v29  ;;  %v1264_v33 = vrot.slane %v1097_v29, %v1246_v18  ;;  %s1108_s15 = sshll.u32 (%p1212_p5), %s1078_s12, 3 }
  0x2b   : > { %v269_v34 = vcombine.high %v261_v25, %v261_v25  ;;  %v270_v35 = vcombine.high %v268_v26, %v268_v26  ;;  %v300_v36 = vcombine.high %v292_v27, %v292_v27  ;;  %v310_v37 = vrot.slane %v261_v25, %v1249_v20  ;;  %s967_s20 = scalar_lea.vmem (%p1212_p5), %s1420_s2, %s1108_s15 }
  0x2c   : > { %v301_v38 = vcombine.high %v299_v30, %v299_v30  ;;  %v314_v39 = vrot.slane %v268_v26, %v1249_v20  ;;  %v331_v40 = vsub.f32 %v292_v27, %v261_v25  ;;  %v332_v41 = vsub.f32 %v299_v30, %v268_v26 }
  0x2d   : > { %v318_v42 = vrot.slane %v269_v34, %v1249_v20  ;;  %v322_v43 = vrot.slane %v270_v35, %v1249_v20  ;;  %v1270_v44 = vmul.f32 %v310_v37, %v306_v22  ;;  %v333_v45 = vsub.f32 %v300_v36, %v269_v34 }
  0x2e   : > { %v1272_v46 = vmul.f32 %v314_v39, %v306_v22  ;;  %v334_v47 = vsub.f32 %v301_v38, %v270_v35  ;;  %v342_v48 = vrot.slane %v331_v40, %v1249_v20  ;;  %v346_v49 = vrot.slane %v332_v41, %v1249_v20 }
  0x2f   : > { %v1276_v50 = vmul.f32 %v318_v42, %v306_v22  ;;  %v1278_v51 = vmul.f32 %v322_v43, %v306_v22  ;;  %v350_v52 = vrot.slane %v333_v45, %v1249_v20  ;;  %v363_v53 = vadd.f32 %v292_v27, %v261_v25 }
  0x30   : > { %v354_v54 = vrot.slane %v334_v47, %v1249_v20  ;;  %v359_v55 = vmul.f32 %v342_v48, %v242_v12  ;;  %v360_v56 = vmul.f32 %v346_v49, %v242_v12  ;;  %v364_v57 = vadd.f32 %v299_v30, %v268_v26 }
  0x31   : > { %v361_v58 = vmul.f32 %v350_v52, %v242_v12  ;;  %v365_v59 = vadd.f32 %v300_v36, %v269_v34  ;;  %v366_v60 = vadd.f32 %v301_v38, %v270_v35  ;;  %v374_v61 = vrot.slane %v363_v53, %v1249_v20 }
  0x32   : > { %v362_v62 = vmul.f32 %v354_v54, %v242_v12  ;;  %v378_v63 = vrot.slane %v364_v57, %v1249_v20  ;;  %v403_v0 = vadd.f32 %v359_v55, %v1270_v44  ;;  %v404_v1 = vadd.f32 %v360_v56, %v1272_v46 }
  0x33   : > { %v382_v2 = vrot.slane %v365_v59, %v1249_v20  ;;  %v386_v3 = vrot.slane %v366_v60, %v1249_v20  ;;  %v1289_v4 = vmul.f32 %v1241_v13, %v374_v61  ;;  %v405_v5 = vadd.f32 %v361_v58, %v1276_v50  ;;  %v1099_v59 = vld.sshfl [vmem:[%s1243_s9 + $0x8] sm:$0x33 pattern:$0x75316420] }
  0x34   : > { %v1295_v8 = vmul.f32 %v1241_v13, %v378_v63  ;;  %v406_v9 = vadd.f32 %v362_v62, %v1278_v51  ;;  %v436_v10 = vrot.slane %v422_v28, %v1246_v18  ;;  %v437_v11 = vcombine.high %v1261_v31, %v1261_v31 }
  0x35   : > { %v1302_v12 = vmul.f32 %v1241_v13, %v382_v2  ;;  %v1305_v14 = vmul.f32 %v1241_v13, %v386_v3  ;;  %v395_v15 = vsub.f32 %v1270_v44, %v1289_v4  ;;  %v466_v16 = vrot.slane %v452_v32, %v1246_v18  ;;  %v1101_v2 = vld.sshfl [vmem:[%s1243_s9 + $0x18] sm:$0x33 pattern:$0x75316420] }
  0x36   : > { %v396_v17 = vsub.f32 %v1272_v46, %v1295_v8  ;;  %v438_v19 = vcombine.high %v436_v10, %v436_v10  ;;  %v467_v21 = vcombine.high %v1264_v33, %v1264_v33  ;;  %v473_v22 = vadd.f32 %v1094_v7, %v411_v6 }
  0x37   : > { %v397_v23 = vsub.f32 %v1276_v50, %v1302_v12  ;;  %v398_v13 = vsub.f32 %v1278_v51, %v1305_v14  ;;  %v468_v25 = vcombine.high %v466_v16, %v466_v16  ;;  %v477_v26 = vrot.slane %v1261_v31, %v1249_v20  ;;  %v578_v14 = vld [vmem:[%s1237_s8 + $0x4] sm:$0x3] }
  0x38   : > { %v481_v27 = vrot.slane %v436_v10, %v1249_v20  ;;  %v485_v28 = vrot.slane %v437_v11, %v1249_v20  ;;  %v489_v29 = vrot.slane %v438_v19, %v1249_v20  ;;  %v498_v30 = vsub.f32 %v1264_v33, %v1261_v31 }
  0x39   : > { %v494_v32 = vmul.f32 %v477_v26, %v473_v22  ;;  %v499_v34 = vsub.f32 %v466_v16, %v436_v10  ;;  %v500_v35 = vsub.f32 %v467_v21, %v437_v11  ;;  %v501_v36 = vsub.f32 %v468_v25, %v438_v19 }
  0x3a   : > { %v495_v37 = vmul.f32 %v481_v27, %v473_v22  ;;  %v496_v38 = vmul.f32 %v485_v28, %v473_v22  ;;  %v497_v39 = vmul.f32 %v489_v29, %v473_v22  ;;  %v509_v40 = vrot.slane %v498_v30, %v1249_v20 }
  0x3b   : > { %v513_v41 = vrot.slane %v499_v34, %v1249_v20  ;;  %v517_v42 = vrot.slane %v500_v35, %v1249_v20  ;;  %v521_v43 = vrot.slane %v501_v36, %v1249_v20  ;;  %v530_v44 = vadd.f32 %v1264_v33, %v1261_v31 }
  0x3c   : > { %v526_v45 = vmul.f32 %v509_v40, %v411_v6  ;;  %v531_v46 = vadd.f32 %v466_v16, %v436_v10  ;;  %v532_v47 = vadd.f32 %v467_v21, %v437_v11  ;;  %v533_v48 = vadd.f32 %v468_v25, %v438_v19  ;;  %v1098_v16 = vld [vmem:[%s1237_s8 + $0xc] sm:$0x3] }
  0x3d   : > { %v527_v49 = vmul.f32 %v513_v41, %v411_v6  ;;  %v528_v50 = vmul.f32 %v517_v42, %v411_v6  ;;  %v529_v51 = vmul.f32 %v521_v43, %v411_v6  ;;  %v541_v52 = vrot.slane %v530_v44, %v1249_v20 }
  0x3e   : > { %v545_v53 = vrot.slane %v531_v46, %v1249_v20  ;;  %v549_v54 = vrot.slane %v532_v47, %v1249_v20  ;;  %v553_v55 = vrot.slane %v533_v48, %v1249_v20  ;;  %v570_v56 = vadd.f32 %v526_v45, %v494_v32 }
  0x3f   : > { %v558_v57 = vmul.f32 %v1094_v7, %v541_v52  ;;  %v571_v31 = vadd.f32 %v527_v49, %v495_v37  ;;  %v572_v33 = vadd.f32 %v528_v50, %v496_v38  ;;  %v573_v58 = vadd.f32 %v529_v51, %v497_v39 }
  0x40   : > { %v559_v60 = vmul.f32 %v1094_v7, %v545_v53  ;;  %v560_v61 = vmul.f32 %v1094_v7, %v549_v54  ;;  %v561_v62 = vmul.f32 %v1094_v7, %v553_v55  ;;  %v574_v63 = vadd.f32 %v570_v56, %v403_v0 }
  0x41   : > { %v562_v3 = vsub.f32 %v494_v32, %v558_v57  ;;  %v575_v4 = vadd.f32 %v571_v31, %v404_v1  ;;  %v576_v6 = vadd.f32 %v572_v33, %v405_v5  ;;  %v1337_v8 = vadd.f32 %v573_v58, %v406_v9  ;;  %v1103_v58 = vld.sshfl [vmem:[%s1243_s9 + $0xc] sm:$0x33 pattern:$0x75316420] }
  0x42   : > { %v563_v10 = vsub.f32 %v495_v37, %v559_v60  ;;  %v564_v11 = vsub.f32 %v496_v38, %v560_v61  ;;  %v565_v12 = vsub.f32 %v497_v39, %v561_v62  ;;  %v589_v19 = vcombine.high %v1099_v59, %v1099_v59 }
  0x43   : > { %v1341_v21 = vadd.f32 %v562_v3, %v395_v15  ;;  %v596_v22 = vrot.slane %v1099_v59, %v1246_v18  ;;  %v619_v25 = vcombine.high %v1101_v2, %v1101_v2  ;;  %v626_v7 = vrot.slane %v1101_v2, %v1246_v18  ;;  %v1105_v2 = vld.sshfl [vmem:[%s1243_s9 + $0x1c] sm:$0x33 pattern:$0x75316420] }
  0x44   : > { %v567_v0 = vadd.f32 %v563_v10, %v396_v17  ;;  %v1345_v26 = vadd.f32 %v564_v11, %v397_v23  ;;  %v1347_v1 = vadd.f32 %v565_v12, %v398_v13  ;;  %v603_v5 = vrot.slane %v589_v19, %v1246_v18 }
  0x45   : > { %v604_v9 = vcombine.high %v596_v22, %v596_v22  ;;  %v633_v27 = vrot.slane %v619_v25, %v1246_v18  ;;  %v634_v28 = vcombine.high %v626_v7, %v626_v7  ;;  %v640_v29 = vadd.f32 %v1098_v16, %v578_v14 }
  0x46   : > { %v605_v30 = vcombine.high %v603_v5, %v603_v5  ;;  %v644_v15 = vrot.slane %v596_v22, %v1249_v20  ;;  %v648_v32 = vrot.slane %v603_v5, %v1249_v20  ;;  %v665_v34 = vsub.f32 %v626_v7, %v596_v22 }
  0x47   : > { %v635_v35 = vcombine.high %v633_v27, %v633_v27  ;;  %v652_v17 = vrot.slane %v604_v9, %v1249_v20  ;;  %v666_v23 = vsub.f32 %v633_v27, %v603_v5  ;;  %v667_v36 = vsub.f32 %v634_v28, %v604_v9 }
  0x48   : > { %v656_v13 = vrot.slane %v605_v30, %v1249_v20  ;;  %v661_v37 = vmul.f32 %v644_v15, %v640_v29  ;;  %v662_v38 = vmul.f32 %v648_v32, %v640_v29  ;;  %v676_v39 = vrot.slane %v665_v34, %v1249_v20 }
  0x49   : > { %v663_v40 = vmul.f32 %v652_v17, %v640_v29  ;;  %v668_v41 = vsub.f32 %v635_v35, %v605_v30  ;;  %v680_v42 = vrot.slane %v666_v23, %v1249_v20  ;;  %v684_v43 = vrot.slane %v667_v36, %v1249_v20 }
  0x4a   : > { %v664_v44 = vmul.f32 %v656_v13, %v640_v29  ;;  %v693_v45 = vmul.f32 %v676_v39, %v578_v14  ;;  %v697_v46 = vadd.f32 %v626_v7, %v596_v22  ;;  %v698_v47 = vadd.f32 %v633_v27, %v603_v5  ;;  %v1102_v27 = vld [vmem:[%s1237_s8 + $0xe] sm:$0x3] }
  0x4b   : > { %v688_v48 = vrot.slane %v668_v41, %v1249_v20  ;;  %v694_v49 = vmul.f32 %v680_v42, %v578_v14  ;;  %v695_v50 = vmul.f32 %v684_v43, %v578_v14  ;;  %v699_v51 = vadd.f32 %v634_v28, %v604_v9  ;;  %v745_v9 = vld [vmem:[%s1237_s8 + $0x6] sm:$0x3] }
  0x4c   : > { %v700_v52 = vadd.f32 %v635_v35, %v605_v30  ;;  %v708_v53 = vrot.slane %v697_v46, %v1249_v20  ;;  %v712_v54 = vrot.slane %v698_v47, %v1249_v20  ;;  %v737_v55 = vadd.f32 %v693_v45, %v661_v37 }
  0x4d   : > { %v696_v56 = vmul.f32 %v688_v48, %v578_v14  ;;  %v716_v57 = vrot.slane %v699_v51, %v1249_v20  ;;  %v738_v31 = vadd.f32 %v694_v49, %v662_v38  ;;  %v739_v33 = vadd.f32 %v695_v50, %v663_v40 }
  0x4e   : > { %v720_v59 = vrot.slane %v700_v52, %v1249_v20  ;;  %v725_v60 = vmul.f32 %v1098_v16, %v708_v53  ;;  %v726_v61 = vmul.f32 %v1098_v16, %v712_v54  ;;  %v1364_v62 = vadd.f32 %v737_v55, %v574_v63 }
  0x4f   : > { %v727_v3 = vmul.f32 %v1098_v16, %v716_v57  ;;  %v740_v10 = vadd.f32 %v696_v56, %v664_v44  ;;  %v1367_v11 = vadd.f32 %v738_v31, %v575_v4  ;;  %v1369_v12 = vadd.f32 %v739_v33, %v576_v6 }
  0x50   : > { %v728_v14 = vmul.f32 %v1098_v16, %v720_v59  ;;  %v729_v19 = vsub.f32 %v661_v37, %v725_v60  ;;  %v730_v22 = vsub.f32 %v662_v38, %v726_v61  ;;  %v756_v25 = vcombine.high %v1103_v58, %v1103_v58 }
  0x51   : > { %v731_v7 = vsub.f32 %v663_v40, %v727_v3  ;;  %v744_v5 = vadd.f32 %v740_v10, %v1337_v8  ;;  %v763_v28 = vrot.slane %v1103_v58, %v1246_v18  ;;  %v786_v63 = vcombine.high %v1105_v2, %v1105_v2 }
  0x52   : > { %v732_v29 = vsub.f32 %v664_v44, %v728_v14  ;;  %v733_v30 = vadd.f32 %v729_v19, %v1341_v21  ;;  %v734_v15 = vadd.f32 %v730_v22, %v567_v0  ;;  %v770_v4 = vrot.slane %v756_v25, %v1246_v18 }
  0x53   : > { %v735_v6 = vadd.f32 %v731_v7, %v1345_v26  ;;  %v771_v16 = vcombine.high %v763_v28, %v763_v28  ;;  %v793_v32 = vrot.slane %v1105_v2, %v1246_v18  ;;  %v800_v34 = vrot.slane %v786_v63, %v1246_v18 }
  0x54   : > { %v736_v8 = vadd.f32 %v732_v29, %v1347_v1  ;;  %v772_v35 = vcombine.high %v770_v4, %v770_v4  ;;  %v807_v17 = vadd.f32 %v1102_v27, %v745_v9  ;;  %v811_v23 = vrot.slane %v763_v28, %v1249_v20 }
  0x55   : > { %v801_v36 = vcombine.high %v793_v32, %v793_v32  ;;  %v802_v13 = vcombine.high %v800_v34, %v800_v34  ;;  %v815_v21 = vrot.slane %v770_v4, %v1249_v20  ;;  %v819_v0 = vrot.slane %v771_v16, %v1249_v20 }
  0x56   : > { %v823_v37 = vrot.slane %v772_v35, %v1249_v20  ;;  %v828_v26 = vmul.f32 %v811_v23, %v807_v17  ;;  %v832_v38 = vsub.f32 %v793_v32, %v763_v28  ;;  %v833_v39 = vsub.f32 %v800_v34, %v770_v4 }
  0x57   : > { %v829_v40 = vmul.f32 %v815_v21, %v807_v17  ;;  %v830_v41 = vmul.f32 %v819_v0, %v807_v17  ;;  %v834_v18 = vsub.f32 %v801_v36, %v771_v16  ;;  %v835_v42 = vsub.f32 %v802_v13, %v772_v35 }
  0x58   : > { %v831_v1 = vmul.f32 %v823_v37, %v807_v17  ;;  %v843_v43 = vrot.slane %v832_v38, %v1249_v20  ;;  %v847_v44 = vrot.slane %v833_v39, %v1249_v20  ;;  %v864_v45 = vadd.f32 %v793_v32, %v763_v28 }
  0x59   : > { %v851_v46 = vrot.slane %v834_v18, %v1249_v20  ;;  %v855_v47 = vrot.slane %v835_v42, %v1249_v20  ;;  %v865_v48 = vadd.f32 %v800_v34, %v770_v4  ;;  %v866_v49 = vadd.f32 %v801_v36, %v771_v16 }
  0x5a   : > { %v860_v50 = vmul.f32 %v843_v43, %v745_v9  ;;  %v861_v51 = vmul.f32 %v847_v44, %v745_v9  ;;  %v867_v52 = vadd.f32 %v802_v13, %v772_v35  ;;  %v875_v53 = vrot.slane %v864_v45, %v1249_v20 }
  0x5b   : > { %v862_v54 = vmul.f32 %v851_v46, %v745_v9  ;;  %v863_v55 = vmul.f32 %v855_v47, %v745_v9  ;;  %v879_v56 = vrot.slane %v865_v48, %v1249_v20  ;;  %v883_v57 = vrot.slane %v866_v49, %v1249_v20 }
  0x5c   : > { %v887_v31 = vrot.slane %v867_v52, %v1249_v20  ;;  %v892_v33 = vmul.f32 %v1102_v27, %v875_v53  ;;  %v904_v58 = vadd.f32 %v860_v50, %v828_v26  ;;  %v905_v59 = vadd.f32 %v861_v51, %v829_v40 }
  0x5d   : > { %v893_v60 = vmul.f32 %v1102_v27, %v879_v56  ;;  %v894_v61 = vmul.f32 %v1102_v27, %v883_v57  ;;  %v906_v2 = vadd.f32 %v862_v54, %v830_v41  ;;  %v907_v3 = vadd.f32 %v863_v55, %v831_v1 }
  0x5e   : > { %v895_v10 = vmul.f32 %v1102_v27, %v887_v31  ;;  %v896_v14 = vsub.f32 %v828_v26, %v892_v33  ;;  %v908_v19 = vadd.f32 %v904_v58, %v1364_v62  ;;  %v909_v22 = vadd.f32 %v905_v59, %v1367_v11 }
  0x5f   : > { %v897_v25 = vsub.f32 %v829_v40, %v893_v60  ;;  %v898_v7 = vsub.f32 %v830_v41, %v894_v61  ;;  %v910_v9 = vadd.f32 %v906_v2, %v1369_v12  ;;  %v911_v28 = vadd.f32 %v907_v3, %v744_v5 }
  0x60   : > { %v899_v20 = vsub.f32 %v831_v1, %v895_v10  ;;  %v900_v63 = vadd.f32 %v896_v14, %v733_v30  ;;  %v939_v29 = vcombine.low %v908_v19, %v909_v22 }
  0x61   : > { %v901_v4 = vadd.f32 %v897_v25, %v734_v15  ;;  %v902_v16 = vadd.f32 %v898_v7, %v735_v6  ;;  %v940_v32 = vcombine.low %v910_v9, %v911_v28 }
  0x62   : > { %v903_v34 = vadd.f32 %v899_v20, %v736_v8  ;;  %v947_v27 = vrot.slane %v939_v29, %v1253_v24 }
  0x63   : > { %v916_v35 = vcombine.low %v900_v63, %v901_v4  ;;  %v954_v62 = vrot.slane %v940_v32, %v1253_v24 }
  0x64   : > { %v917_v17 = vcombine.low %v902_v16, %v903_v34  ;;  %965 = sbr.rel (!%p1212_p5) target bundleno = 115 (0x73), region = 108 }
  0x65   : > { %v924_v11 = vrot.slane %v916_v35, %v1253_v24  ;;  %v955_v23 = vcombine.low %v947_v27, %v954_v62 }
  0x66   : > { %v931_v12 = vrot.slane %v917_v17, %v1253_v24 }
  0x67   : > { %1106 = vst [vmem:[%s241_s14 + $0x8] sm:$0xff] %v955_v23 }
  0x68   : > { %v932_v5 = vcombine.low %v924_v11, %v931_v12 }
  0x6a   : > { %934 = vst [vmem:[%s241_s14] sm:$0xff] %v932_v5 }
  0x6e   : > { %v999_v15 = vld [vmem:[%s241_s14 + $0x8] sm:$0xff] }
  0x6f   : > { %1000 = vst [vmem:[%s967_s20 + $0x10] sm:$0xff] %v999_v15 }
  0x71   : > { %v997_v30 = vld [vmem:[%s241_s14] sm:$0xff] }
  0x72   : > { %998 = vst [vmem:[%s967_s20] sm:$0xff] %v997_v30 }
  0x73 PF: > { %p9_p10 = scmp.ge.s32.totalorder %s1195_s13, 4   ;;  %s1423_s9 = smov %s1155_s10 }
  0x74   : > { %s1424_s10 = smov %s1206_s16  ;;  %s1425_s11 = smov %s1195_s13 }
  0x75   :  { %11 = sbr.rel (!%p9_p10) target bundleno = 2 (0x2), region = 188 }

// kernel: reverse.1
= control target key start
LH: loop header
LB: loop body
LE: loop exit
PB: predicated region body
PF: predicated region fallthrough
CT: control target
= control target key end

     0   :  { %s1352_s0 = inlined_call_operand.vmem [shape: f32[2,4,16,16,7], index: 0, kind: input, shape index: {}]   ;;  %s1353_s1 = inlined_call_operand.vmem [shape: f32[2,4,16,16,7], index: 1, kind: output, shape index: {}]  }
   0x1   :  { %v448_v0 = vld [vmem:[%s1352_s0 + $0x60] sm:$0xff]  ;;  %v451_v2 = vld [vmem:[%s1352_s0 + $0xd0] sm:$0xff]  ;;  %v558_v56 = vld [vmem:[%s1352_s0 + $0x68] sm:$0xff] }
   0x2   :  { %v449_v1 = vld [vmem:[%s1352_s0 + $0x220] sm:$0xff]  ;;  %4 = vst [vmem:[%s1353_s1] sm:$0xff] %v448_v0  ;;  %452 = vst [vmem:[%s1353_s1 + $0x70] sm:$0xff] %v451_v2  ;;  %v453_v3 = vld [vmem:[%s1352_s0 + $0x290] sm:$0xff] }
   0x3   :  { %450 = vst [vmem:[%s1353_s1 + $0x1c0] sm:$0xff] %v449_v1  ;;  %v455_v4 = vld [vmem:[%s1352_s0 + $0x140] sm:$0xff]  ;;  %454 = vst [vmem:[%s1353_s1 + $0x230] sm:$0xff] %v453_v3  ;;  %v459_v6 = vld [vmem:[%s1352_s0 + $0x1b0] sm:$0xff] }
   0x4   :  { %v457_v5 = vld [vmem:[%s1352_s0 + $0x300] sm:$0xff]  ;;  %456 = vst [vmem:[%s1353_s1 + $0xe0] sm:$0xff] %v455_v4  ;;  %v461_v7 = vld [vmem:[%s1352_s0 + $0x370] sm:$0xff]  ;;  %460 = vst [vmem:[%s1353_s1 + $0x150] sm:$0xff] %v459_v6 }
   0x5   :  { %458 = vst [vmem:[%s1353_s1 + $0x2a0] sm:$0xff] %v457_v5  ;;  %v463_v8 = vld [vmem:[%s1352_s0 + $0x50] sm:$0xff]  ;;  %462 = vst [vmem:[%s1353_s1 + $0x310] sm:$0xff] %v461_v7  ;;  %v467_v10 = vld [vmem:[%s1352_s0 + $0xc0] sm:$0xff] }
   0x6   :  { %464 = vst [vmem:[%s1353_s1 + $0x10] sm:$0xff] %v463_v8  ;;  %v465_v9 = vld [vmem:[%s1352_s0 + $0x210] sm:$0xff]  ;;  %v469_v11 = vld [vmem:[%s1352_s0 + $0x280] sm:$0xff]  ;;  %468 = vst [vmem:[%s1353_s1 + $0x80] sm:$0xff] %v467_v10 }
   0x7   :  { %466 = vst [vmem:[%s1353_s1 + $0x1d0] sm:$0xff] %v465_v9  ;;  %470 = vst [vmem:[%s1353_s1 + $0x240] sm:$0xff] %v469_v11  ;;  %v471_v12 = vld [vmem:[%s1352_s0 + $0x130] sm:$0xff]  ;;  %v475_v14 = vld [vmem:[%s1352_s0 + $0x1a0] sm:$0xff] }
   0x8   :  { %v473_v13 = vld [vmem:[%s1352_s0 + $0x2f0] sm:$0xff]  ;;  %472 = vst [vmem:[%s1353_s1 + $0xf0] sm:$0xff] %v471_v12  ;;  %476 = vst [vmem:[%s1353_s1 + $0x160] sm:$0xff] %v475_v14  ;;  %v477_v15 = vld [vmem:[%s1352_s0 + $0x360] sm:$0xff] }
   0x9   :  { %474 = vst [vmem:[%s1353_s1 + $0x2b0] sm:$0xff] %v473_v13  ;;  %v479_v16 = vld [vmem:[%s1352_s0 + $0x40] sm:$0xff]  ;;  %478 = vst [vmem:[%s1353_s1 + $0x320] sm:$0xff] %v477_v15  ;;  %v483_v18 = vld [vmem:[%s1352_s0 + $0xb0] sm:$0xff] }
   0xa   :  { %v481_v17 = vld [vmem:[%s1352_s0 + $0x200] sm:$0xff]  ;;  %480 = vst [vmem:[%s1353_s1 + $0x20] sm:$0xff] %v479_v16  ;;  %v485_v19 = vld [vmem:[%s1352_s0 + $0x270] sm:$0xff]  ;;  %484 = vst [vmem:[%s1353_s1 + $0x90] sm:$0xff] %v483_v18 }
   0xb   :  { %482 = vst [vmem:[%s1353_s1 + $0x1e0] sm:$0xff] %v481_v17  ;;  %v487_v20 = vld [vmem:[%s1352_s0 + $0x120] sm:$0xff]  ;;  %486 = vst [vmem:[%s1353_s1 + $0x250] sm:$0xff] %v485_v19  ;;  %v491_v22 = vld [vmem:[%s1352_s0 + $0x190] sm:$0xff] }
   0xc   :  { %488 = vst [vmem:[%s1353_s1 + $0x100] sm:$0xff] %v487_v20  ;;  %v489_v21 = vld [vmem:[%s1352_s0 + $0x2e0] sm:$0xff]  ;;  %v493_v23 = vld [vmem:[%s1352_s0 + $0x350] sm:$0xff]  ;;  %492 = vst [vmem:[%s1353_s1 + $0x170] sm:$0xff] %v491_v22 }
   0xd   :  { %490 = vst [vmem:[%s1353_s1 + $0x2c0] sm:$0xff] %v489_v21  ;;  %494 = vst [vmem:[%s1353_s1 + $0x330] sm:$0xff] %v493_v23  ;;  %v495_v24 = vld [vmem:[%s1352_s0 + $0x30] sm:$0xff]  ;;  %v499_v26 = vld [vmem:[%s1352_s0 + $0xa0] sm:$0xff] }
   0xe   :  { %v497_v25 = vld [vmem:[%s1352_s0 + $0x1f0] sm:$0xff]  ;;  %496 = vst [vmem:[%s1353_s1 + $0x30] sm:$0xff] %v495_v24  ;;  %500 = vst [vmem:[%s1353_s1 + $0xa0] sm:$0xff] %v499_v26  ;;  %v501_v27 = vld [vmem:[%s1352_s0 + $0x260] sm:$0xff] }
   0xf   :  { %498 = vst [vmem:[%s1353_s1 + $0x1f0] sm:$0xff] %v497_v25  ;;  %v503_v28 = vld [vmem:[%s1352_s0 + $0x110] sm:$0xff]  ;;  %502 = vst [vmem:[%s1353_s1 + $0x260] sm:$0xff] %v501_v27  ;;  %v507_v30 = vld [vmem:[%s1352_s0 + $0x180] sm:$0xff] }
  0x10   :  { %v505_v29 = vld [vmem:[%s1352_s0 + $0x2d0] sm:$0xff]  ;;  %504 = vst [vmem:[%s1353_s1 + $0x110] sm:$0xff] %v503_v28  ;;  %v509_v31 = vld [vmem:[%s1352_s0 + $0x340] sm:$0xff]  ;;  %508 = vst [vmem:[%s1353_s1 + $0x180] sm:$0xff] %v507_v30 }
  0x11   :  { %506 = vst [vmem:[%s1353_s1 + $0x2d0] sm:$0xff] %v505_v29  ;;  %v511_v32 = vld [vmem:[%s1352_s0 + $0x20] sm:$0xff]  ;;  %510 = vst [vmem:[%s1353_s1 + $0x340] sm:$0xff] %v509_v31  ;;  %v515_v34 = vld [vmem:[%s1352_s0 + $0x90] sm:$0xff] }
  0x12   :  { %512 = vst [vmem:[%s1353_s1 + $0x40] sm:$0xff] %v511_v32  ;;  %v513_v33 = vld [vmem:[%s1352_s0 + $0x1e0] sm:$0xff]  ;;  %v517_v35 = vld [vmem:[%s1352_s0 + $0x250] sm:$0xff]  ;;  %516 = vst [vmem:[%s1353_s1 + $0xb0] sm:$0xff] %v515_v34 }
  0x13   :  { %514 = vst [vmem:[%s1353_s1 + $0x200] sm:$0xff] %v513_v33  ;;  %518 = vst [vmem:[%s1353_s1 + $0x270] sm:$0xff] %v517_v35  ;;  %v519_v36 = vld [vmem:[%s1352_s0 + $0x100] sm:$0xff]  ;;  %v523_v38 = vld [vmem:[%s1352_s0 + $0x170] sm:$0xff] }
  0x14   :  { %v521_v37 = vld [vmem:[%s1352_s0 + $0x2c0] sm:$0xff]  ;;  %520 = vst [vmem:[%s1353_s1 + $0x120] sm:$0xff] %v519_v36  ;;  %524 = vst [vmem:[%s1353_s1 + $0x190] sm:$0xff] %v523_v38  ;;  %v525_v39 = vld [vmem:[%s1352_s0 + $0x330] sm:$0xff] }
  0x15   :  { %522 = vst [vmem:[%s1353_s1 + $0x2e0] sm:$0xff] %v521_v37  ;;  %v527_v40 = vld [vmem:[%s1352_s0 + $0x10] sm:$0xff]  ;;  %526 = vst [vmem:[%s1353_s1 + $0x350] sm:$0xff] %v525_v39  ;;  %v531_v42 = vld [vmem:[%s1352_s0 + $0x80] sm:$0xff] }
  0x16   :  { %v529_v41 = vld [vmem:[%s1352_s0 + $0x1d0] sm:$0xff]  ;;  %528 = vst [vmem:[%s1353_s1 + $0x50] sm:$0xff] %v527_v40  ;;  %v533_v43 = vld [vmem:[%s1352_s0 + $0x240] sm:$0xff]  ;;  %532 = vst [vmem:[%s1353_s1 + $0xc0] sm:$0xff] %v531_v42 }
  0x17   :  { %530 = vst [vmem:[%s1353_s1 + $0x210] sm:$0xff] %v529_v41  ;;  %v535_v44 = vld [vmem:[%s1352_s0 + $0xf0] sm:$0xff]  ;;  %534 = vst [vmem:[%s1353_s1 + $0x280] sm:$0xff] %v533_v43  ;;  %v539_v46 = vld [vmem:[%s1352_s0 + $0x160] sm:$0xff] }
  0x18   :  { %536 = vst [vmem:[%s1353_s1 + $0x130] sm:$0xff] %v535_v44  ;;  %v537_v45 = vld [vmem:[%s1352_s0 + $0x2b0] sm:$0xff]  ;;  %v541_v47 = vld [vmem:[%s1352_s0 + $0x320] sm:$0xff]  ;;  %540 = vst [vmem:[%s1353_s1 + $0x1a0] sm:$0xff] %v539_v46 }
  0x19   :  { %538 = vst [vmem:[%s1353_s1 + $0x2f0] sm:$0xff] %v537_v45  ;;  %542 = vst [vmem:[%s1353_s1 + $0x360] sm:$0xff] %v541_v47  ;;  %v193_v48 = vld [vmem:[%s1352_s0] sm:$0xff]  ;;  %v546_v50 = vld [vmem:[%s1352_s0 + $0x70] sm:$0xff] }
  0x1a   :  { %v544_v49 = vld [vmem:[%s1352_s0 + $0x1c0] sm:$0xff]  ;;  %543 = vst [vmem:[%s1353_s1 + $0x60] sm:$0xff] %v193_v48  ;;  %547 = vst [vmem:[%s1353_s1 + $0xd0] sm:$0xff] %v546_v50  ;;  %v548_v51 = vld [vmem:[%s1352_s0 + $0x230] sm:$0xff] }
  0x1b   :  { %545 = vst [vmem:[%s1353_s1 + $0x220] sm:$0xff] %v544_v49  ;;  %v550_v52 = vld [vmem:[%s1352_s0 + $0xe0] sm:$0xff]  ;;  %549 = vst [vmem:[%s1353_s1 + $0x290] sm:$0xff] %v548_v51  ;;  %v554_v54 = vld [vmem:[%s1352_s0 + $0x150] sm:$0xff] }
  0x1c   :  { %v552_v53 = vld [vmem:[%s1352_s0 + $0x2a0] sm:$0xff]  ;;  %551 = vst [vmem:[%s1353_s1 + $0x140] sm:$0xff] %v550_v52  ;;  %v556_v55 = vld [vmem:[%s1352_s0 + $0x310] sm:$0xff]  ;;  %555 = vst [vmem:[%s1353_s1 + $0x1b0] sm:$0xff] %v554_v54 }
  0x1d   :  { %553 = vst [vmem:[%s1353_s1 + $0x300] sm:$0xff] %v552_v53  ;;  %557 = vst [vmem:[%s1353_s1 + $0x370] sm:$0xff] %v556_v55  ;;  %v560_v57 = vld [vmem:[%s1352_s0 + $0x228] sm:$0xff]  ;;  %v562_v58 = vld [vmem:[%s1352_s0 + $0xd8] sm:$0xff] }
  0x1e   :  { %559 = vst [vmem:[%s1353_s1 + $0x8] sm:$0xff] %v558_v56  ;;  %v564_v59 = vld [vmem:[%s1352_s0 + $0x298] sm:$0xff]  ;;  %561 = vst [vmem:[%s1353_s1 + $0x1c8] sm:$0xff] %v560_v57  ;;  %v566_v60 = vld [vmem:[%s1352_s0 + $0x148] sm:$0xff] }
  0x1f   :  { %563 = vst [vmem:[%s1353_s1 + $0x78] sm:$0xff] %v562_v58  ;;  %565 = vst [vmem:[%s1353_s1 + $0x238] sm:$0xff] %v564_v59  ;;  %v568_v61 = vld [vmem:[%s1352_s0 + $0x308] sm:$0xff]  ;;  %v570_v62 = vld [vmem:[%s1352_s0 + $0x1b8] sm:$0xff] }
  0x20   :  { %567 = vst [vmem:[%s1353_s1 + $0xe8] sm:$0xff] %v566_v60  ;;  %569 = vst [vmem:[%s1353_s1 + $0x2a8] sm:$0xff] %v568_v61  ;;  %v572_v63 = vld [vmem:[%s1352_s0 + $0x378] sm:$0xff]  ;;  %v578_v2 = vld [vmem:[%s1352_s0 + $0xc8] sm:$0xff] }
  0x21   :  { %571 = vst [vmem:[%s1353_s1 + $0x158] sm:$0xff] %v570_v62  ;;  %v574_v0 = vld [vmem:[%s1352_s0 + $0x58] sm:$0xff]  ;;  %573 = vst [vmem:[%s1353_s1 + $0x318] sm:$0xff] %v572_v63  ;;  %v580_v3 = vld [vmem:[%s1352_s0 + $0x288] sm:$0xff] }
  0x22   :  { %v576_v1 = vld [vmem:[%s1352_s0 + $0x218] sm:$0xff]  ;;  %575 = vst [vmem:[%s1353_s1 + $0x18] sm:$0xff] %v574_v0  ;;  %579 = vst [vmem:[%s1353_s1 + $0x88] sm:$0xff] %v578_v2  ;;  %v586_v6 = vld [vmem:[%s1352_s0 + $0x1a8] sm:$0xff] }
  0x23   :  { %577 = vst [vmem:[%s1353_s1 + $0x1d8] sm:$0xff] %v576_v1  ;;  %v582_v4 = vld [vmem:[%s1352_s0 + $0x138] sm:$0xff]  ;;  %581 = vst [vmem:[%s1353_s1 + $0x248] sm:$0xff] %v580_v3  ;;  %v588_v7 = vld [vmem:[%s1352_s0 + $0x368] sm:$0xff] }
  0x24   :  { %583 = vst [vmem:[%s1353_s1 + $0xf8] sm:$0xff] %v582_v4  ;;  %v584_v5 = vld [vmem:[%s1352_s0 + $0x2f8] sm:$0xff]  ;;  %587 = vst [vmem:[%s1353_s1 + $0x168] sm:$0xff] %v586_v6  ;;  %v590_v8 = vld [vmem:[%s1352_s0 + $0x48] sm:$0xff] }
  0x25   :  { %585 = vst [vmem:[%s1353_s1 + $0x2b8] sm:$0xff] %v584_v5  ;;  %589 = vst [vmem:[%s1353_s1 + $0x328] sm:$0xff] %v588_v7  ;;  %v592_v9 = vld [vmem:[%s1352_s0 + $0x208] sm:$0xff]  ;;  %v594_v10 = vld [vmem:[%s1352_s0 + $0xb8] sm:$0xff] }
  0x26   :  { %591 = vst [vmem:[%s1353_s1 + $0x28] sm:$0xff] %v590_v8  ;;  %593 = vst [vmem:[%s1353_s1 + $0x1e8] sm:$0xff] %v592_v9  ;;  %v596_v11 = vld [vmem:[%s1352_s0 + $0x278] sm:$0xff]  ;;  %v598_v12 = vld [vmem:[%s1352_s0 + $0x128] sm:$0xff] }
  0x27   :  { %595 = vst [vmem:[%s1353_s1 + $0x98] sm:$0xff] %v594_v10  ;;  %v600_v13 = vld [vmem:[%s1352_s0 + $0x2e8] sm:$0xff]  ;;  %597 = vst [vmem:[%s1353_s1 + $0x258] sm:$0xff] %v596_v11  ;;  %v602_v14 = vld [vmem:[%s1352_s0 + $0x198] sm:$0xff] }
  0x28   :  { %599 = vst [vmem:[%s1353_s1 + $0x108] sm:$0xff] %v598_v12  ;;  %601 = vst [vmem:[%s1353_s1 + $0x2c8] sm:$0xff] %v600_v13  ;;  %v604_v15 = vld [vmem:[%s1352_s0 + $0x358] sm:$0xff]  ;;  %v610_v18 = vld [vmem:[%s1352_s0 + $0xa8] sm:$0xff] }
  0x29   :  { %v606_v16 = vld [vmem:[%s1352_s0 + $0x38] sm:$0xff]  ;;  %603 = vst [vmem:[%s1353_s1 + $0x178] sm:$0xff] %v602_v14  ;;  %605 = vst [vmem:[%s1353_s1 + $0x338] sm:$0xff] %v604_v15  ;;  %v612_v19 = vld [vmem:[%s1352_s0 + $0x268] sm:$0xff] }
  0x2a   :  { %607 = vst [vmem:[%s1353_s1 + $0x38] sm:$0xff] %v606_v16  ;;  %v608_v17 = vld [vmem:[%s1352_s0 + $0x1f8] sm:$0xff]  ;;  %611 = vst [vmem:[%s1353_s1 + $0xa8] sm:$0xff] %v610_v18  ;;  %v618_v22 = vld [vmem:[%s1352_s0 + $0x188] sm:$0xff] }
  0x2b   :  { %609 = vst [vmem:[%s1353_s1 + $0x1f8] sm:$0xff] %v608_v17  ;;  %613 = vst [vmem:[%s1353_s1 + $0x268] sm:$0xff] %v612_v19  ;;  %v614_v20 = vld [vmem:[%s1352_s0 + $0x118] sm:$0xff]  ;;  %v620_v23 = vld [vmem:[%s1352_s0 + $0x348] sm:$0xff] }
  0x2c   :  { %v616_v21 = vld [vmem:[%s1352_s0 + $0x2d8] sm:$0xff]  ;;  %615 = vst [vmem:[%s1353_s1 + $0x118] sm:$0xff] %v614_v20  ;;  %619 = vst [vmem:[%s1353_s1 + $0x188] sm:$0xff] %v618_v22  ;;  %v622_v24 = vld [vmem:[%s1352_s0 + $0x28] sm:$0xff] }
  0x2d   :  { %617 = vst [vmem:[%s1353_s1 + $0x2d8] sm:$0xff] %v616_v21  ;;  %v624_v25 = vld [vmem:[%s1352_s0 + $0x1e8] sm:$0xff]  ;;  %621 = vst [vmem:[%s1353_s1 + $0x348] sm:$0xff] %v620_v23  ;;  %v626_v26 = vld [vmem:[%s1352_s0 + $0x98] sm:$0xff] }
  0x2e   :  { %623 = vst [vmem:[%s1353_s1 + $0x48] sm:$0xff] %v622_v24  ;;  %625 = vst [vmem:[%s1353_s1 + $0x208] sm:$0xff] %v624_v25  ;;  %v628_v27 = vld [vmem:[%s1352_s0 + $0x258] sm:$0xff]  ;;  %v630_v28 = vld [vmem:[%s1352_s0 + $0x108] sm:$0xff] }
  0x2f   :  { %627 = vst [vmem:[%s1353_s1 + $0xb8] sm:$0xff] %v626_v26  ;;  %629 = vst [vmem:[%s1353_s1 + $0x278] sm:$0xff] %v628_v27  ;;  %v632_v29 = vld [vmem:[%s1352_s0 + $0x2c8] sm:$0xff]  ;;  %v634_v30 = vld [vmem:[%s1352_s0 + $0x178] sm:$0xff] }
  0x30   :  { %631 = vst [vmem:[%s1353_s1 + $0x128] sm:$0xff] %v630_v28  ;;  %v636_v31 = vld [vmem:[%s1352_s0 + $0x338] sm:$0xff]  ;;  %633 = vst [vmem:[%s1353_s1 + $0x2e8] sm:$0xff] %v632_v29  ;;  %v642_v34 = vld [vmem:[%s1352_s0 + $0x88] sm:$0xff] }
  0x31   :  { %635 = vst [vmem:[%s1353_s1 + $0x198] sm:$0xff] %v634_v30  ;;  %637 = vst [vmem:[%s1353_s1 + $0x358] sm:$0xff] %v636_v31  ;;  %v638_v32 = vld [vmem:[%s1352_s0 + $0x18] sm:$0xff]  ;;  %v644_v35 = vld [vmem:[%s1352_s0 + $0x248] sm:$0xff] }
  0x32   :  { %v640_v33 = vld [vmem:[%s1352_s0 + $0x1d8] sm:$0xff]  ;;  %639 = vst [vmem:[%s1353_s1 + $0x58] sm:$0xff] %v638_v32  ;;  %643 = vst [vmem:[%s1353_s1 + $0xc8] sm:$0xff] %v642_v34  ;;  %v650_v38 = vld [vmem:[%s1352_s0 + $0x168] sm:$0xff] }
  0x33   :  { %641 = vst [vmem:[%s1353_s1 + $0x218] sm:$0xff] %v640_v33  ;;  %v646_v36 = vld [vmem:[%s1352_s0 + $0xf8] sm:$0xff]  ;;  %645 = vst [vmem:[%s1353_s1 + $0x288] sm:$0xff] %v644_v35  ;;  %v652_v39 = vld [vmem:[%s1352_s0 + $0x328] sm:$0xff] }
  0x34   :  { %v648_v37 = vld [vmem:[%s1352_s0 + $0x2b8] sm:$0xff]  ;;  %647 = vst [vmem:[%s1353_s1 + $0x138] sm:$0xff] %v646_v36  ;;  %v654_v40 = vld [vmem:[%s1352_s0 + $0x8] sm:$0xff]  ;;  %651 = vst [vmem:[%s1353_s1 + $0x1a8] sm:$0xff] %v650_v38 }
  0x35   :  { %649 = vst [vmem:[%s1353_s1 + $0x2f8] sm:$0xff] %v648_v37  ;;  %653 = vst [vmem:[%s1353_s1 + $0x368] sm:$0xff] %v652_v39  ;;  %v656_v41 = vld [vmem:[%s1352_s0 + $0x1c8] sm:$0xff]  ;;  %v658_v42 = vld [vmem:[%s1352_s0 + $0x78] sm:$0xff] }
  0x36   :  { %655 = vst [vmem:[%s1353_s1 + $0x68] sm:$0xff] %v654_v40  ;;  %v660_v43 = vld [vmem:[%s1352_s0 + $0x238] sm:$0xff]  ;;  %657 = vst [vmem:[%s1353_s1 + $0x228] sm:$0xff] %v656_v41  ;;  %v662_v44 = vld [vmem:[%s1352_s0 + $0xe8] sm:$0xff] }
  0x37   :  { %659 = vst [vmem:[%s1353_s1 + $0xd8] sm:$0xff] %v658_v42  ;;  %661 = vst [vmem:[%s1353_s1 + $0x298] sm:$0xff] %v660_v43  ;;  %v664_v45 = vld [vmem:[%s1352_s0 + $0x2a8] sm:$0xff]  ;;  %v666_v46 = vld [vmem:[%s1352_s0 + $0x158] sm:$0xff] }
  0x38   :  { %663 = vst [vmem:[%s1353_s1 + $0x148] sm:$0xff] %v662_v44  ;;  %665 = vst [vmem:[%s1353_s1 + $0x308] sm:$0xff] %v664_v45  ;;  %v668_v47 = vld [vmem:[%s1352_s0 + $0x318] sm:$0xff] }
  0x39   :  { %667 = vst [vmem:[%s1353_s1 + $0x1b8] sm:$0xff] %v666_v46  ;;  %669 = vst [vmem:[%s1353_s1 + $0x378] sm:$0xff] %v668_v47 }

</bundles_post_ra>
